<compile_context>
chip_gen: v5e
topology: v5e:2x2
jax: 0.10.0
libtpu: 0.0.40
codegen_flags: <defaults>
</compile_context>

<pallas_src>
import functools

import jax
import jax.numpy as jnp
from jax import lax
from jax.experimental import pallas as pl
from jax.experimental.pallas import tpu as pltpu


def _bytes_per_block_elem(itemsize: int) -> int:
    # 2 inputs x 2 pipeline buffers x itemsize  +  ~6 live f32 temporaries.
    return 4 * itemsize + 24


def _vmem_limits():
    """Generation-aware (vmem_limit_bytes, block_sizing_budget_bytes)."""
    phys = None
    try:
        info = pltpu.get_tpu_info()
        phys = int(getattr(info, "vmem_capacity_bytes", 0)) or None
    except Exception:
        phys = None
    if phys is None:
        phys = 64 * 1024 * 1024  # conservative fallback: v7x physical VMEM/TC
    # Kernel VMEM limit: 3/4 of physical, capped at 96 MiB.
    #   v7x (64 MiB)  -> 48 MiB;  v5e/v6e (128 MiB) -> 96 MiB.
    limit = min((phys * 3) // 4, 96 * 1024 * 1024)
    # Block-sizing budget: half the limit, leaving headroom for output blocks,
    # scratch vectors, and Mosaic internals.
    return limit, limit // 2


def _choose_tiles(batch: int, n_classes: int, itemsize: int, budget: int):
    """Pick (tile_b, tile_c) whose total VMEM footprint fits `budget`."""
    sublane = {4: 8, 2: 16, 1: 32}.get(itemsize, 8)
    bpe = _bytes_per_block_elem(itemsize)
    max_elems = max(budget // bpe, sublane * 128)

    # Class tile: keep full C in one block when it fits alongside the minimum
    # batch tile; otherwise a lane-aligned chunk (online-logsumexp over C).
    if n_classes * sublane <= max_elems:
        tc = n_classes
    else:
        tc = max(128, ((max_elems // sublane) // 128) * 128)

    # Batch tile: as large as the budget allows ...
    tb = max(sublane, ((max_elems // max(tc, 1)) // sublane) * sublane)
    # ... but keep >= 2 batch tiles when possible so the 'parallel' axis can be
    # sharded across both v7x TensorCores (no-op on single-TC v5e/v6e).
    if batch > sublane:
        half = (((batch + 1) // 2) + sublane - 1) // sublane * sublane
        tb = min(tb, half)
    tb = min(tb, batch)
    if tb < batch:
        tb = max(sublane, (tb // sublane) * sublane)
    return tb, tc


def _kd_kernel(ys_ref, yt_ref, kl_ref,
               m_s_ref, z_s_ref, m_t_ref, z_t_ref, w_ref,
               *, temperature: float, n_classes: int, tile_c: int):
    """Online per-row KL(softmax(y_t/T) || softmax(y_s/T)) over class tiles.

    Uses the identity (valid since sum_c p_t == 1):
      kl_row = sum_c p_t * (t_c - s_c) + logZ_s - logZ_t
             = W / z_t + (m_s + log z_s) - (m_t + log z_t)
    with running max m_*, running sum-of-exp z_*, running weighted sum W.
    """
    c = pl.program_id(1)

    inv_t = 1.0 / temperature
    s = ys_ref[...].astype(jnp.float32) * inv_t          # [TB, TC]
    t = yt_ref[...].astype(jnp.float32) * inv_t          # [TB, TC]

    masked = (n_classes % tile_c) != 0                   # static Python bool
    if masked:
        col = c * tile_c + lax.broadcasted_iota(jnp.int32, s.shape, 1)
        valid = col < n_classes
        s_for_max = jnp.where(valid, s, -jnp.inf)
        t_for_max = jnp.where(valid, t, -jnp.inf)
    else:
        s_for_max, t_for_max = s, t

    @pl.when(c == 0)
    def _init():
        m_s_ref[...] = jnp.full_like(m_s_ref, -jnp.inf)
        m_t_ref[...] = jnp.full_like(m_t_ref, -jnp.inf)
        z_s_ref[...] = jnp.zeros_like(z_s_ref)
        z_t_ref[...] = jnp.zeros_like(z_t_ref)
        w_ref[...] = jnp.zeros_like(w_ref)

    # Online-logsumexp update (numerically stable, flat VMEM in C).
    m_s_new = jnp.maximum(m_s_ref[...], jnp.max(s_for_max, axis=1, keepdims=True))
    m_t_new = jnp.maximum(m_t_ref[...], jnp.max(t_for_max, axis=1, keepdims=True))

    e_s = jnp.exp(s - m_s_new)                           # [TB, TC]
    e_t = jnp.exp(t - m_t_new)                           # [TB, TC]
    w_term = e_t * (t - s)                               # [TB, TC]
    if masked:
        e_s = jnp.where(valid, e_s, 0.0)
        e_t = jnp.where(valid, e_t, 0.0)
        w_term = jnp.where(valid, w_term, 0.0)

    # Rescale factors only touch [TB, 1] vectors -> negligible EUP/VPU cost.
    a_s = jnp.exp(m_s_ref[...] - m_s_new)
    a_t = jnp.exp(m_t_ref[...] - m_t_new)
    z_s_ref[...] = a_s * z_s_ref[...] + jnp.sum(e_s, axis=1, keepdims=True)
    z_t_ref[...] = a_t * z_t_ref[...] + jnp.sum(e_t, axis=1, keepdims=True)
    w_ref[...] = a_t * w_ref[...] + jnp.sum(w_term, axis=1, keepdims=True)
    m_s_ref[...] = m_s_new
    m_t_ref[...] = m_t_new

    @pl.when(c == pl.num_programs(1) - 1)
    def _finalize():
        z_s = z_s_ref[...]
        z_t = z_t_ref[...]
        # Exact divide on a [TB, 1] vector is essentially free; keeps tight
        # numerics for the final per-row KL.
        kl_ref[...] = (w_ref[...] / z_t
                       + (m_s_ref[...] + jnp.log(z_s))
                       - (m_t_ref[...] + jnp.log(z_t)))


def distill_kl_nll(y_s: jax.Array, y_t: jax.Array, T: float,
                   *, tile_b: int | None = None,
                   tile_c: int | None = None) -> jax.Array:
    """Pallas equivalent of DistillKL_NLL(T)(y_s, y_t). Returns a scalar f32.

    Tip: pass bf16 logits when available — the kernel upcasts internally and
    the loss is HBM-bandwidth-bound, so halving input bytes is the big win.
    """
    assert y_s.shape == y_t.shape and y_s.ndim == 2
    B, C = y_s.shape
    itemsize = jnp.dtype(y_s.dtype).itemsize
    sublane = {4: 8, 2: 16, 1: 32}.get(itemsize, 8)

    vmem_limit, block_budget = _vmem_limits()
    tb, tc = _choose_tiles(B, C, itemsize, block_budget)

    # Clamp / round user overrides to legal block shapes.
    if tile_b is not None:
        tb = min(int(tile_b), B)
        if tb < B:
            tb = max(sublane, (tb // sublane) * sublane)
    if tile_c is not None:
        tc = min(int(tile_c), C)
        if tc < C:
            tc = ((max(tc, 1) + 127) // 128) * 128
            if tc >= C:
                tc = C

    est_bytes = tb * tc * _bytes_per_block_elem(itemsize)
    if est_bytes > vmem_limit:
        raise ValueError(
            f"Block ({tb}, {tc}) needs ~{est_bytes} B of VMEM (inputs x double "
            f"buffers + f32 temporaries), exceeding the {vmem_limit} B limit; "
            f"pass smaller tile_b / tile_c.")

    grid = (pl.cdiv(B, tb), pl.cdiv(C, tc))

    per_row_kl = pl.pallas_call(
        functools.partial(_kd_kernel, temperature=float(T),
                          n_classes=C, tile_c=tc),
        out_shape=jax.ShapeDtypeStruct((B, 1), jnp.float32),
        grid=grid,
        in_specs=[
            pl.BlockSpec((tb, tc), lambda b, c: (b, c)),
            pl.BlockSpec((tb, tc), lambda b, c: (b, c)),
        ],
        out_specs=pl.BlockSpec((tb, 1), lambda b, c: (b, 0)),
        scratch_shapes=[pltpu.VMEM((tb, 1), jnp.float32) for _ in range(5)],
        compiler_params=pltpu.CompilerParams(
            dimension_semantics=("parallel", "arbitrary"),
            vmem_limit_bytes=vmem_limit,
        ),
        cost_estimate=pl.CostEstimate(
            flops=10 * B * C,
            transcendentals=2 * B * C,
            bytes_accessed=2 * B * C * itemsize + B * 4,
        ),
    )(y_s, y_t)

    # Tiny final reduction + 'batchmean' + T^2 scaling in plain JAX.
    return jnp.sum(per_row_kl) * (float(T) * float(T) / B)


def _reference(y_s, y_t, T):
    """Pure-JAX reference matching the PyTorch module."""
    log_p_s = jax.nn.log_softmax(y_s / T, axis=1)
    p_t = jax.nn.softmax(y_t / T, axis=1)
    log_p_t = jax.nn.log_softmax(y_t / T, axis=1)
    kl = jnp.sum(p_t * (log_p_t - log_p_s)) / y_s.shape[0]
    return kl * T * T


if __name__ == "__main__":
    key = jax.random.PRNGKey(0)

    # (batch, classes, T, dtype, tile_b, tile_c)
    configs = [
        (8, 32, 4.0, jnp.float32, None, None),     # single tile, full-dim blocks
        (24, 128, 4.0, jnp.float32, None, None),   # 2 batch tiles ('parallel')
        (20, 130, 2.0, jnp.float32, 8, 128),       # partial tiles + class mask
        (16, 512, 4.0, jnp.float32, 8, 128),       # 4 class tiles: online path
        (32, 256, 4.0, jnp.bfloat16, None, None),  # bf16 logits (half HBM bytes)
    ]

    for (B, C, T, dtype, tb, tc) in configs:
        key, k1, k2 = jax.random.split(key, 3)
        y_s = jax.random.normal(k1, (B, C), dtype=jnp.float32).astype(dtype)
        y_t = jax.random.normal(k2, (B, C), dtype=jnp.float32).astype(dtype)

        loss = jax.block_until_ready(
            distill_kl_nll(y_s, y_t, T, tile_b=tb, tile_c=tc))
        ref = _reference(y_s.astype(jnp.float32), y_t.astype(jnp.float32), T)
        assert jnp.allclose(loss, ref, rtol=1e-4, atol=1e-6), (
            (B, C, T, str(dtype), float(loss), float(ref)))

    print("KERNEL_OK")
</pallas_src>

<mosaic_0001>
module attributes {stable_mosaic.version = 11 : i64} {
  func.func @_kd_kernel(%arg0: i32, %arg1: i32, %arg2: memref<8x32xf32, #tpu.memory_space<vmem>>, %arg3: memref<8x32xf32, #tpu.memory_space<vmem>>, %arg4: memref<8x1xf32, #tpu.memory_space<vmem>>, %arg5: memref<8x1xf32, #tpu.memory_space<vmem>>, %arg6: memref<8x1xf32, #tpu.memory_space<vmem>>, %arg7: memref<8x1xf32, #tpu.memory_space<vmem>>, %arg8: memref<8x1xf32, #tpu.memory_space<vmem>>, %arg9: memref<8x1xf32, #tpu.memory_space<vmem>>) attributes {dimension_semantics = [#tpu.dimension_semantics<parallel>, #tpu.dimension_semantics<arbitrary>], iteration_bounds = array<i64: 1, 1>, scalar_prefetch = 0 : i64, scratch_operands = 5 : i64, tpu.core_type = #tpu.core_type<tc>, window_params = [{transform_indices = @transform_0, window_bounds = array<i64: 8, 32>}, {transform_indices = @transform_1, window_bounds = array<i64: 8, 32>}, {transform_indices = @transform_2, window_bounds = array<i64: 8, 1>}]} {
    %c0 = arith.constant 0 : index
    %c0_0 = arith.constant 0 : index
    %0 = vector.load %arg2[%c0, %c0_0] : memref<8x32xf32, #tpu.memory_space<vmem>>, vector<8x32xf32>
    %cst = arith.constant 2.500000e-01 : f32
    %1 = vector.broadcast %cst : f32 to vector<8x32xf32>
    %2 = arith.mulf %0, %1 : vector<8x32xf32>
    %c0_1 = arith.constant 0 : index
    %c0_2 = arith.constant 0 : index
    %3 = vector.load %arg3[%c0_1, %c0_2] : memref<8x32xf32, #tpu.memory_space<vmem>>, vector<8x32xf32>
    %cst_3 = arith.constant 2.500000e-01 : f32
    %4 = vector.broadcast %cst_3 : f32 to vector<8x32xf32>
    %5 = arith.mulf %3, %4 : vector<8x32xf32>
    %c0_i32 = arith.constant 0 : i32
    %6 = arith.cmpi eq, %arg1, %c0_i32 : i32
    %7 = arith.extui %6 : i1 to i32
    %c0_i32_4 = arith.constant 0 : i32
    %8 = arith.cmpi ne, %7, %c0_i32_4 : i32
    scf.if %8 {
      %cst_36 = arith.constant 0xFF800000 : f32
      %54 = vector.broadcast %cst_36 : f32 to vector<8x1xf32>
      %c0_37 = arith.constant 0 : index
      %c0_38 = arith.constant 0 : index
      %55 = vector.load %arg5[%c0_37, %c0_38] : memref<8x1xf32, #tpu.memory_space<vmem>>, vector<8x1xf32>
      tpu.vector_store %arg5[%c0_37, %c0_38], %54 {strides = array<i32>} : memref<8x1xf32, #tpu.memory_space<vmem>>, vector<8x1xf32>,
      %cst_39 = arith.constant 0xFF800000 : f32
      %56 = vector.broadcast %cst_39 : f32 to vector<8x1xf32>
      %c0_40 = arith.constant 0 : index
      %c0_41 = arith.constant 0 : index
      %57 = vector.load %arg7[%c0_40, %c0_41] : memref<8x1xf32, #tpu.memory_space<vmem>>, vector<8x1xf32>
      tpu.vector_store %arg7[%c0_40, %c0_41], %56 {strides = array<i32>} : memref<8x1xf32, #tpu.memory_space<vmem>>, vector<8x1xf32>,
      %cst_42 = arith.constant 0.000000e+00 : f32
      %58 = vector.broadcast %cst_42 : f32 to vector<8x1xf32>
      %c0_43 = arith.constant 0 : index
      %c0_44 = arith.constant 0 : index
      %59 = vector.load %arg6[%c0_43, %c0_44] : memref<8x1xf32, #tpu.memory_space<vmem>>, vector<8x1xf32>
      tpu.vector_store %arg6[%c0_43, %c0_44], %58 {strides = array<i32>} : memref<8x1xf32, #tpu.memory_space<vmem>>, vector<8x1xf32>,
      %cst_45 = arith.constant 0.000000e+00 : f32
      %60 = vector.broadcast %cst_45 : f32 to vector<8x1xf32>
      %c0_46 = arith.constant 0 : index
      %c0_47 = arith.constant 0 : index
      %61 = vector.load %arg8[%c0_46, %c0_47] : memref<8x1xf32, #tpu.memory_space<vmem>>, vector<8x1xf32>
      tpu.vector_store %arg8[%c0_46, %c0_47], %60 {strides = array<i32>} : memref<8x1xf32, #tpu.memory_space<vmem>>, vector<8x1xf32>,
      %cst_48 = arith.constant 0.000000e+00 : f32
      %62 = vector.broadcast %cst_48 : f32 to vector<8x1xf32>
      %c0_49 = arith.constant 0 : index
      %c0_50 = arith.constant 0 : index
      %63 = vector.load %arg9[%c0_49, %c0_50] : memref<8x1xf32, #tpu.memory_space<vmem>>, vector<8x1xf32>
      tpu.vector_store %arg9[%c0_49, %c0_50], %62 {strides = array<i32>} : memref<8x1xf32, #tpu.memory_space<vmem>>, vector<8x1xf32>,
    } else {
    }
    %c0_5 = arith.constant 0 : index
    %c0_6 = arith.constant 0 : index
    %9 = vector.load %arg5[%c0_5, %c0_6] : memref<8x1xf32, #tpu.memory_space<vmem>>, vector<8x1xf32>
    %cst_7 = arith.constant dense<0xFF800000> : vector<8xf32>
    %10 = vector.multi_reduction <maximumf>, %2, %cst_7 [1] : vector<8x32xf32> to vector<8xf32>
    %11 = vector.shape_cast %10 : vector<8xf32> to vector<8x1xf32>
    %12 = arith.maximumf %9, %11 : vector<8x1xf32>
    %c0_8 = arith.constant 0 : index
    %c0_9 = arith.constant 0 : index
    %13 = vector.load %arg7[%c0_8, %c0_9] : memref<8x1xf32, #tpu.memory_space<vmem>>, vector<8x1xf32>
    %cst_10 = arith.constant dense<0xFF800000> : vector<8xf32>
    %14 = vector.multi_reduction <maximumf>, %5, %cst_10 [1] : vector<8x32xf32> to vector<8xf32>
    %15 = vector.shape_cast %14 : vector<8xf32> to vector<8x1xf32>
    %16 = arith.maximumf %13, %15 : vector<8x1xf32>
    %17 = vector.broadcast %12 : vector<8x1xf32> to vector<8x32xf32>
    %18 = arith.subf %2, %17 : vector<8x32xf32>
    %19 = math.exp %18 : vector<8x32xf32>
    %20 = vector.broadcast %16 : vector<8x1xf32> to vector<8x32xf32>
    %21 = arith.subf %5, %20 : vector<8x32xf32>
    %22 = math.exp %21 : vector<8x32xf32>
    %23 = arith.subf %5, %2 : vector<8x32xf32>
    %24 = arith.mulf %22, %23 : vector<8x32xf32>
    %c0_11 = arith.constant 0 : index
    %c0_12 = arith.constant 0 : index
    %25 = vector.load %arg5[%c0_11, %c0_12] : memref<8x1xf32, #tpu.memory_space<vmem>>, vector<8x1xf32>
    %26 = arith.subf %25, %12 : vector<8x1xf32>
    %27 = math.exp %26 : vector<8x1xf32>
    %c0_13 = arith.constant 0 : index
    %c0_14 = arith.constant 0 : index
    %28 = vector.load %arg7[%c0_13, %c0_14] : memref<8x1xf32, #tpu.memory_space<vmem>>, vector<8x1xf32>
    %29 = arith.subf %28, %16 : vector<8x1xf32>
    %30 = math.exp %29 : vector<8x1xf32>
    %c0_15 = arith.constant 0 : index
    %c0_16 = arith.constant 0 : index
    %31 = vector.load %arg6[%c0_15, %c0_16] : memref<8x1xf32, #tpu.memory_space<vmem>>, vector<8x1xf32>
    %32 = arith.mulf %27, %31 : vector<8x1xf32>
    %cst_17 = arith.constant dense<0.000000e+00> : vector<8xf32>
    %33 = vector.multi_reduction <add>, %19, %cst_17 [1] : vector<8x32xf32> to vector<8xf32>
    %34 = vector.shape_cast %33 : vector<8xf32> to vector<8x1xf32>
    %35 = arith.addf %32, %34 : vector<8x1xf32>
    %c0_18 = arith.constant 0 : index
    %c0_19 = arith.constant 0 : index
    %36 = vector.load %arg6[%c0_18, %c0_19] : memref<8x1xf32, #tpu.memory_space<vmem>>, vector<8x1xf32>
    tpu.vector_store %arg6[%c0_18, %c0_19], %35 {strides = array<i32>} : memref<8x1xf32, #tpu.memory_space<vmem>>, vector<8x1xf32>,
    %c0_20 = arith.constant 0 : index
    %c0_21 = arith.constant 0 : index
    %37 = vector.load %arg8[%c0_20, %c0_21] : memref<8x1xf32, #tpu.memory_space<vmem>>, vector<8x1xf32>
    %38 = arith.mulf %30, %37 : vector<8x1xf32>
    %cst_22 = arith.constant dense<0.000000e+00> : vector<8xf32>
    %39 = vector.multi_reduction <add>, %22, %cst_22 [1] : vector<8x32xf32> to vector<8xf32>
    %40 = vector.shape_cast %39 : vector<8xf32> to vector<8x1xf32>
    %41 = arith.addf %38, %40 : vector<8x1xf32>
    %c0_23 = arith.constant 0 : index
    %c0_24 = arith.constant 0 : index
    %42 = vector.load %arg8[%c0_23, %c0_24] : memref<8x1xf32, #tpu.memory_space<vmem>>, vector<8x1xf32>
    tpu.vector_store %arg8[%c0_23, %c0_24], %41 {strides = array<i32>} : memref<8x1xf32, #tpu.memory_space<vmem>>, vector<8x1xf32>,
    %c0_25 = arith.constant 0 : index
    %c0_26 = arith.constant 0 : index
    %43 = vector.load %arg9[%c0_25, %c0_26] : memref<8x1xf32, #tpu.memory_space<vmem>>, vector<8x1xf32>
    %44 = arith.mulf %30, %43 : vector<8x1xf32>
    %cst_27 = arith.constant dense<0.000000e+00> : vector<8xf32>
    %45 = vector.multi_reduction <add>, %24, %cst_27 [1] : vector<8x32xf32> to vector<8xf32>
    %46 = vector.shape_cast %45 : vector<8xf32> to vector<8x1xf32>
    %47 = arith.addf %44, %46 : vector<8x1xf32>
    %c0_28 = arith.constant 0 : index
    %c0_29 = arith.constant 0 : index
    %48 = vector.load %arg9[%c0_28, %c0_29] : memref<8x1xf32, #tpu.memory_space<vmem>>, vector<8x1xf32>
    tpu.vector_store %arg9[%c0_28, %c0_29], %47 {strides = array<i32>} : memref<8x1xf32, #tpu.memory_space<vmem>>, vector<8x1xf32>,
    %c0_30 = arith.constant 0 : index
    %c0_31 = arith.constant 0 : index
    %49 = vector.load %arg5[%c0_30, %c0_31] : memref<8x1xf32, #tpu.memory_space<vmem>>, vector<8x1xf32>
    tpu.vector_store %arg5[%c0_30, %c0_31], %12 {strides = array<i32>} : memref<8x1xf32, #tpu.memory_space<vmem>>, vector<8x1xf32>,
    %c0_32 = arith.constant 0 : index
    %c0_33 = arith.constant 0 : index
    %50 = vector.load %arg7[%c0_32, %c0_33] : memref<8x1xf32, #tpu.memory_space<vmem>>, vector<8x1xf32>
    tpu.vector_store %arg7[%c0_32, %c0_33], %16 {strides = array<i32>} : memref<8x1xf32, #tpu.memory_space<vmem>>, vector<8x1xf32>,
    %c0_i32_34 = arith.constant 0 : i32
    %51 = arith.cmpi eq, %arg1, %c0_i32_34 : i32
    %52 = arith.extui %51 : i1 to i32
    %c0_i32_35 = arith.constant 0 : i32
    %53 = arith.cmpi ne, %52, %c0_i32_35 : i32
    scf.if %53 {
      %c0_36 = arith.constant 0 : index
      %c0_37 = arith.constant 0 : index
      %54 = vector.load %arg6[%c0_36, %c0_37] : memref<8x1xf32, #tpu.memory_space<vmem>>, vector<8x1xf32>
      %c0_38 = arith.constant 0 : index
      %c0_39 = arith.constant 0 : index
      %55 = vector.load %arg8[%c0_38, %c0_39] : memref<8x1xf32, #tpu.memory_space<vmem>>, vector<8x1xf32>
      %c0_40 = arith.constant 0 : index
      %c0_41 = arith.constant 0 : index
      %56 = vector.load %arg9[%c0_40, %c0_41] : memref<8x1xf32, #tpu.memory_space<vmem>>, vector<8x1xf32>
      %57 = arith.divf %56, %55 : vector<8x1xf32>
      %c0_42 = arith.constant 0 : index
      %c0_43 = arith.constant 0 : index
      %58 = vector.load %arg5[%c0_42, %c0_43] : memref<8x1xf32, #tpu.memory_space<vmem>>, vector<8x1xf32>
      %59 = math.log %54 : vector<8x1xf32>
      %60 = arith.addf %58, %59 : vector<8x1xf32>
      %61 = arith.addf %57, %60 : vector<8x1xf32>
      %c0_44 = arith.constant 0 : index
      %c0_45 = arith.constant 0 : index
      %62 = vector.load %arg7[%c0_44, %c0_45] : memref<8x1xf32, #tpu.memory_space<vmem>>, vector<8x1xf32>
      %63 = math.log %55 : vector<8x1xf32>
      %64 = arith.addf %62, %63 : vector<8x1xf32>
      %65 = arith.subf %61, %64 : vector<8x1xf32>
      %c0_46 = arith.constant 0 : index
      %c0_47 = arith.constant 0 : index
      %66 = vector.load %arg4[%c0_46, %c0_47] : memref<8x1xf32, #tpu.memory_space<vmem>>, vector<8x1xf32>
      tpu.vector_store %arg4[%c0_46, %c0_47], %65 {strides = array<i32>} : memref<8x1xf32, #tpu.memory_space<vmem>>, vector<8x1xf32>,
    } else {
    }
    return
  }
  func.func @transform_0(%arg0: i32, %arg1: i32) -> (i32, i32) {
    %c0_i32 = arith.constant 0 : i32
    return %arg0, %arg1 : i32, i32
  }
  func.func @transform_1(%arg0: i32, %arg1: i32) -> (i32, i32) {
    %c0_i32 = arith.constant 0 : i32
    return %arg0, %arg1 : i32, i32
  }
  func.func @transform_2(%arg0: i32, %arg1: i32) -> (i32, i32) {
    %c0_i32 = arith.constant 0 : i32
    %c0_i32_0 = arith.constant 0 : i32
    return %arg0, %c0_i32 : i32, i32
  }
}

</mosaic_0001>

<bundles_post_ra>
// kernel: tpu_custom_call.1
= control target key start
LH: loop header
LB: loop body
LE: loop exit
PB: predicated region body
PF: predicated region fallthrough
CT: control target
= control target key end

     0   :  { %7 = vsyncpa [#allocation8], 0  ;;  %s268_s0 = inlined_call_operand.hbm [shape: f32[8,32], index: 0, kind: input, shape index: {}]   ;;  %s269_s1 = inlined_call_operand.hbm [shape: f32[8,32], index: 1, kind: input, shape index: {}]   ;;  %s270_s2 = inlined_call_operand.vmem [shape: f32[8,1], index: 2, kind: output, shape index: {}]  }
   0x1   :  { %s14_s11 = sshll.u32 %s268_s0, 4  ;;  %s15_s11 = int_to_ptr.hbm [resolvable:$true] %s14_s11 }
   0x2   :  { %8 = vsyncpa [#allocation10], 0  ;;  %s223_s12 = smov [#allocation7]   ;;  %s25_s16 = sshll.u32 %s269_s1, 4  ;;  %s26_s16 = int_to_ptr.hbm [resolvable:$true] %s25_s16 }
   0x3   :  { %s16_s13 = sshll.u32 %s223_s12, 4  ;;  %s224_s17 = smov [#allocation9]   ;;  %s17_s13 = int_to_ptr.vmem [resolvable:$true] %s16_s13 }
   0x4   :  { %19 = dma.hbm_to_vmem [thread:$0]  %s15_s11, 128, %s17_s13, [#allocation8]  }
   0x5   :  { %s27_s18 = sshll.u32 %s224_s17, 4  ;;  %s28_s18 = int_to_ptr.vmem [resolvable:$true] %s27_s18 }
   0x6   :  { %30 = dma.hbm_to_vmem [thread:$0]  %s26_s16, 128, %s28_s18, [#allocation10]  }
   0x7   :  { %219 = dma.done.wait [#allocation8], 128  }
   0x8   :  { %220 = vsyncadd [#allocation8], 4294967168 }
   0x9   :  { %221 = dma.done.wait [#allocation10], 128  }
   0xa   :  { %222 = vsyncadd [#allocation10], 4294967168  ;;  %vm47_vm0 = vcmask 7168   ;;  %v225_v0 = vmov -inf   ;;  %v41_v1 = vld [vmem:[#allocation9] sm:$0xff]  ;;  %vm54_vm1 = vcmask 261120  }
   0xb   :  { %49 = vst.msk [vmem:[#allocation4] sm:$0xff] %vm47_vm0, %v225_v0  ;;  %v42_v2 = vmul.f32 0.25, %v41_v1  ;;  %v39_v3 = vld [vmem:[#allocation7] sm:$0xff]  ;;  %v226_v7 = vmov 0   ;;  %v227_v8 = vmov 0.0  }
   0xc   :  { %48 = vst.msk [vmem:[#allocation2] sm:$0xff] %vm47_vm0, %v225_v0  ;;  %v40_v5 = vmul.f32 0.25, %v39_v3  ;;  %155 = vset.pattern.permute.xlu1 %v226_v7  ;;  %156 = vset.pattern.permute.xlu0 %v226_v7 }
   0xd   :  { %v60_v4 = vsel %vm54_vm1, %v42_v2, -inf  ;;  %51 = vst.msk [vmem:[#allocation5] sm:$0xff] %vm47_vm0, %v227_v8 }
   0xe   :  { %61 = vmax.xlane.f32.xlu0 %v60_v4  ;;  %v55_v6 = vsel %vm54_vm1, %v40_v5, -inf  ;;  %50 = vst.msk [vmem:[#allocation3] sm:$0xff] %vm47_vm0, %v227_v8  ;;  %v80_v21 = vsub.f32 %v42_v2, %v40_v5 }
   0xf   :  { %52 = vst.msk [vmem:[#allocation6] sm:$0xff] %vm47_vm0, %v227_v8 }
  0x12   :  { %v59_v9 = vld [vmem:[#allocation4] sm:$0xff] }
  0x13   :  { %v53_v13 = vld [vmem:[#allocation2] sm:$0xff] }
  0x14   :  { %v96_v33 = vld [vmem:[#allocation5] sm:$0xff] }
  0x15   :  { %v88_v42 = vld [vmem:[#allocation3] sm:$0xff] }
  0x16   :  { %56 = vmax.xlane.f32.xlu0 %v55_v6  ;;  %v103_v34 = vld [vmem:[#allocation6] sm:$0xff] }
  0x81   :  { %v62_v10 = vpop.xlane.xlu0 %61 }
  0x82   :  { %v63_v11 = vmax.f32 %v59_v9, %v62_v10 }
  0x84   :  { %v85_v12 = vsub.f32 %v59_v9, %v63_v11  ;;  %111 = vst.msk [vmem:[#allocation4] sm:$0xff] %vm47_vm0, %v63_v11  ;;  %74 = vperm.xlu1 %155, %v63_v11  }
  0x86   :  { %v86_v30 = vmul.f32 1.442695, %v85_v12 }
  0x89   :  { %v57_v14 = vpop.xlane.xlu0 %56 }
  0x8a   :  { %v58_v15 = vmax.f32 %v53_v13, %v57_v14 }
  0x8c   :  { %v82_v16 = vsub.f32 %v53_v13, %v58_v15  ;;  %110 = vst.msk [vmem:[#allocation2] sm:$0xff] %vm47_vm0, %v58_v15  ;;  %66 = vperm.xlu1 %155, %v58_v15  }
  0x8e   :  { %v83_v31 = vmul.f32 1.442695, %v82_v16 }
  0x93   :  { %v133_v61 = vld [vmem:[#allocation2] sm:$0xff] }
  0xf6   :  { %v75_v17 = vpop.permute.xlu1 %74 }
  0xf7   :  { %v77_v18 = vsub.f32 %v42_v2, %v75_v17  ;;  %v138_v2 = vld [vmem:[#allocation4] sm:$0xff] }
  0xf9   :  { %v78_v19 = vmul.f32 1.442695, %v77_v18 }
  0xfb   :  { %157 = vpow2.f32 %v78_v19 }
  0xfe   :  { %v67_v20 = vpop.permute.xlu1 %66 }
  0xff   :  { %v69_v22 = vsub.f32 %v40_v5, %v67_v20 }
 0x101   :  { %v158_v23 = vpop.eup %157  ;;  %v70_v24 = vmul.f32 1.442695, %v69_v22 }
 0x102   :  { %v98_v25 = vsel %vm54_vm1, %v158_v23, 0.0  ;;  %v81_v26 = vmul.f32 %v158_v23, %v80_v21 }
 0x103   :  { %159 = vpow2.f32 %v70_v24  ;;  %99 = vadd.xlane.f32.xlu2 %v98_v25 }
 0x104   :  { %v105_v27 = vsel %vm54_vm1, %v81_v26, 0.0  ;;  %161 = vpow2.f32 %v86_v30 }
 0x105   :  { %106 = vadd.xlane.f32.xlu0 %v105_v27  ;;  %163 = vpow2.f32 %v83_v31 }
 0x109   :  { %v160_v28 = vpop.eup %159 }
 0x10a   :  { %v90_v29 = vsel %vm54_vm1, %v160_v28, 0.0  ;;  %v162_v32 = vpop.eup %161 }
 0x10b   :  { %91 = vadd.xlane.f32.xlu2 %v90_v29  ;;  %v97_v35 = vmul.f32 %v162_v32, %v96_v33  ;;  %v104_v38 = vmul.f32 %v162_v32, %v103_v34  ;;  %v164_v41 = vpop.eup %163 }
 0x10c   :  { %v89_v43 = vmul.f32 %v164_v41, %v88_v42 }
 0x176   :  { %v100_v36 = vpop.xlane.xlu2 %99 }
 0x177   :  { %v101_v37 = vadd.f32 %v100_v36, %v97_v35 }
 0x178   :  { %v107_v39 = vpop.xlane.xlu0 %106 }
 0x179   :  { %102 = vst.msk [vmem:[#allocation5] sm:$0xff] %vm47_vm0, %v101_v37  ;;  %v108_v40 = vadd.f32 %v107_v39, %v104_v38 }
 0x17b   :  { %109 = vst.msk [vmem:[#allocation6] sm:$0xff] %vm47_vm0, %v108_v40 }
 0x17e   :  { %v92_v44 = vpop.xlane.xlu2 %91 }
 0x17f   :  { %v93_v45 = vadd.f32 %v92_v44, %v89_v43 }
 0x180   :  { %v116_v46 = vld [vmem:[#allocation5] sm:$0xff] }
 0x181   :  { %165 = vrcp.f32 %v116_v46  ;;  %95 = vst.msk [vmem:[#allocation3] sm:$0xff] %vm47_vm0, %v93_v45  ;;  %v129_v51 = vand.u32 2147483648, %v116_v46  ;;  %v127_v53 = vand.u32 2147483647, %v116_v46  ;;  %vm123_vm3 = vweird.f32 %v116_v46 }
 0x182   :  { %167 = vlog2.f32 %v116_v46  ;;  %v117_v63 = vld [vmem:[#allocation6] sm:$0xff] }
 0x183   :  { %v130_v57 = vor.u32 1.1754944e-38, %v129_v51  ;;  %vm128_vm5 = vcmp.eq.f32.partialorder %v127_v53, 8.507059e+37 }
 0x187   :  { %v166_v47 = vpop.eup %165 }
 0x188   :  { %v119_v48 = vmul.f32 %v166_v47, %v116_v46  ;;  %v115_v49 = vld [vmem:[#allocation3] sm:$0xff]  ;;  %vm124_vm2 = vweird.f32 %v166_v47  ;;  %v168_v54 = vpop.eup %167 }
 0x189   :  { %169 = vlog2.f32 %v115_v49  ;;  %vm125_vm4 = vmor %vm123_vm3, %vm124_vm2  ;;  %v140_v58 = vmul.f32 0.6931472, %v168_v54 }
 0x18a   :  { %v120_v50 = vsub.f32 1.0, %v119_v48 }
 0x18b   :  { %v141_v3 = vadd.f32 %v140_v58, %v138_v2 }
 0x18c   :  { %v121_v52 = vmul.f32 %v166_v47, %v120_v50 }
 0x18e   :  { %v122_v55 = vadd.f32 %v166_v47, %v121_v52 }
 0x18f   :  { %v170_v56 = vpop.eup %169 }
 0x190   :  { %v126_v59 = vsel %vm125_vm4, %v166_v47, %v122_v55  ;;  %v135_v60 = vmul.f32 0.6931472, %v170_v56 }
 0x191   :  { %v131_v62 = vsel %vm128_vm5, %v130_v57, %v126_v59 }
 0x192   :  { %v132_v0 = vmul.f32 %v131_v62, %v117_v63  ;;  %v136_v1 = vadd.f32 %v135_v60, %v133_v61 }
 0x194   :  { %v137_v4 = vadd.f32 %v136_v1, %v132_v0 }
 0x196   :  { %v142_v5 = vsub.f32 %v137_v4, %v141_v3 }
 0x198   :  { %143 = vst.msk [vmem:[%s270_s2] sm:$0xff] %vm47_vm0, %v142_v5 }
 0x199   :  { %148 = vsyncpa [#allocation8], 1 }
 0x19a   :  { %149 = vsyncpa [#allocation10], 1 }

</bundles_post_ra>
